<compile_context>
chip_gen: v5e
topology: v5e:2x2
jax: 0.10.0
libtpu: 0.0.40
codegen_flags: <defaults>
</compile_context>

<pallas_src>
import jax
import jax.numpy as jnp
from jax.experimental import pallas as pl
from jax.experimental.pallas import tpu as pltpu


def _chomp_kernel(x_ref, o_ref):
    # Pure block copy.  On the tiled (fast) path the input and output blocks
    # have identical width, so the static slice below is the identity and this
    # is just `o_ref[...] = x_ref[...]`.  On the tiny fallback path
    # (L_out < 128) the input block is the full L and the slice drops the tail.
    o_ref[...] = x_ref[:, : o_ref.shape[-1]]


def chomp1d(x: jax.Array, chomp_size: int) -> jax.Array:
    """Pallas equivalent of Chomp1d(chomp_size)(x) for x of shape (N, C, L)."""
    assert x.ndim == 3, "expected (N, C, L)"
    n, c, l = x.shape
    assert 0 < chomp_size < l, "chomp_size must be in (0, L)"
    l_out = l - chomp_size

    # Flatten batch*channels so the copy is a simple 2-D lane-dense tiling.
    r = n * c
    x2 = x.reshape(r, l)

    # Time (lane) tile: a multiple of 128 whenever possible so non-final
    # blocks are written with full-width (unmasked) stores; only the last
    # partial block pays the masked-store cost.  For tiny L_out fall back to
    # full-dim blocks (perf is irrelevant there, correctness is guaranteed).
    if l_out >= 128:
        tile_l = min(1024, (l_out // 128) * 128)
        in_tile_l = tile_l            # only the kept prefix is ever DMA'd
    else:
        tile_l = l_out                # full output width
        in_tile_l = l                 # full input width; kernel slices tail off

    # Row (sublane) tile: multiple of 8, capped so one buffer stays ~<= 1 MiB.
    tile_r = min(256, (r // 8) * 8) if r >= 8 else r

    grid = (pl.cdiv(r, tile_r), pl.cdiv(l_out, tile_l))

    y2 = pl.pallas_call(
        _chomp_kernel,
        out_shape=jax.ShapeDtypeStruct((r, l_out), x.dtype),
        grid=grid,
        in_specs=[pl.BlockSpec((tile_r, in_tile_l), lambda i, j: (i, j))],
        out_specs=pl.BlockSpec((tile_r, tile_l), lambda i, j: (i, j)),
        compiler_params=pltpu.CompilerParams(
            dimension_semantics=("parallel", "parallel")),
    )(x2)
    return y2.reshape(n, c, l_out)


if __name__ == "__main__":
    # Small shape consistent with the module (N, C, L) — fallback path.
    chomp_size = 3
    N, C, L = 2, 4, 16
    x = jax.random.normal(jax.random.PRNGKey(0), (N, C, L), dtype=jnp.float32)
    y = jax.block_until_ready(chomp1d(x, chomp_size))
    ref = x[:, :, :-chomp_size]
    assert y.shape == ref.shape
    assert jnp.array_equal(y, ref)

    # Slightly longer sequence to exercise the lane-dense tiled path,
    # including partial row / time edge blocks.
    chomp_size2 = 13
    N2, C2, L2 = 3, 5, 301
    x2 = jax.random.normal(jax.random.PRNGKey(0), (N2, C2, L2), dtype=jnp.float32)
    y2 = jax.block_until_ready(chomp1d(x2, chomp_size2))
    ref2 = x2[:, :, :-chomp_size2]
    assert y2.shape == ref2.shape
    assert jnp.array_equal(y2, ref2)

    print("KERNEL_OK")
</pallas_src>

<mosaic_0001>
module attributes {stable_mosaic.version = 11 : i64} {
  func.func @_chomp_kernel(%arg0: i32, %arg1: i32, %arg2: memref<8x16xf32, #tpu.memory_space<vmem>>, %arg3: memref<8x13xf32, #tpu.memory_space<vmem>>) attributes {dimension_semantics = [#tpu.dimension_semantics<parallel>, #tpu.dimension_semantics<parallel>], iteration_bounds = array<i64: 1, 1>, scalar_prefetch = 0 : i64, scratch_operands = 0 : i64, tpu.core_type = #tpu.core_type<tc>, window_params = [{transform_indices = @transform_0, window_bounds = array<i64: 8, 16>}, {transform_indices = @transform_1, window_bounds = array<i64: 8, 13>}]} {
    %c0 = arith.constant 0 : index
    %c0_0 = arith.constant 0 : index
    %0 = vector.load %arg2[%c0, %c0_0] : memref<8x16xf32, #tpu.memory_space<vmem>>, vector<8x13xf32>
    %c0_1 = arith.constant 0 : index
    %c0_2 = arith.constant 0 : index
    %1 = vector.load %arg3[%c0_1, %c0_2] : memref<8x13xf32, #tpu.memory_space<vmem>>, vector<8x13xf32>
    tpu.vector_store %arg3[%c0_1, %c0_2], %0 {strides = array<i32>} : memref<8x13xf32, #tpu.memory_space<vmem>>, vector<8x13xf32>,
    return
  }
  func.func @transform_0(%arg0: i32, %arg1: i32) -> (i32, i32) {
    %c0_i32 = arith.constant 0 : i32
    return %arg0, %arg1 : i32, i32
  }
  func.func @transform_1(%arg0: i32, %arg1: i32) -> (i32, i32) {
    %c0_i32 = arith.constant 0 : i32
    return %arg0, %arg1 : i32, i32
  }
}

</mosaic_0001>

<bundles_post_ra>
// kernel: tpu_custom_call.1
= control target key start
LH: loop header
LB: loop body
LE: loop exit
PB: predicated region body
PF: predicated region fallthrough
CT: control target
= control target key end

     0   :  { %6 = vsyncpa [#allocation3], 0  ;;  %s115_s0 = inlined_call_operand.hbm [shape: f32[8,16], index: 0, kind: input, shape index: {}]   ;;  %s116_s1 = inlined_call_operand.hbm [shape: f32[8,13], index: 1, kind: output, shape index: {}]  }
   0x1   :  { %7 = vsyncpa [#allocation4], 0  ;;  %s13_s8 = sshll.u32 %s115_s0, 4  ;;  %s97_s9 = smov [#allocation2]   ;;  %s14_s8 = int_to_ptr.hbm [resolvable:$true] %s13_s8 }
   0x2   :  { %s15_s10 = sshll.u32 %s97_s9, 4  ;;  %s16_s10 = int_to_ptr.vmem [resolvable:$true] %s15_s10 }
   0x3   :  { %18 = dma.hbm_to_vmem [thread:$0]  %s14_s8, 128, %s16_s10, [#allocation3]  }
   0x4   :  { %93 = dma.done.wait [#allocation3], 128  }
   0x5   :  { %94 = vsyncadd [#allocation3], 4294967168  ;;  %s98_s11 = smov [#allocation5]   ;;  %s33_s15 = sshll.u32 %s116_s1, 4  ;;  %vm24_vm0 = vcmask 105472   ;;  %v23_v0 = vld [vmem:[#allocation2] sm:$0xff]  ;;  %s34_s15 = int_to_ptr.hbm [resolvable:$true] %s33_s15 }
   0x6   :  { %s31_s12 = sshll.u32 %s98_s11, 4  ;;  %25 = vst.msk [vmem:[#allocation5] sm:$0xff] %vm24_vm0, %v23_v0  ;;  %s32_s12 = int_to_ptr.vmem [resolvable:$true] %s31_s12 }
   0x7   :  { %36 = dma.vmem_to_hbm [thread:$0]  %s32_s12, 128, %s34_s15, [#allocation4]  }
   0x8   :  { %95 = dma.done.wait [#allocation4], 128  }
   0x9   :  { %96 = vsyncadd [#allocation4], 4294967168 }
   0xa   :  { %41 = vsyncpa [#allocation3], 1 }
   0xb   :  { %42 = vsyncpa [#allocation4], 1 }

</bundles_post_ra>
